<compile_context>
chip_gen: v6e
topology: v6e:2x2x1
jax: 0.10.0
libtpu: 0.0.40
codegen_flags: <defaults>
</compile_context>

<pallas_src>
import functools

import jax
import jax.numpy as jnp
from jax.experimental import pallas as pl
from jax.experimental.pallas import tpu as pltpu

_LANE = 128
_WIDTH_CANDIDATES = (2048, 1024, 512, 256, 128)
_TARGET_BLOCK_ELEMS = 1024 * 1024     # ~4 MiB f32 per input block per grid step
_SINGLE_BLOCK_ELEMS = 512 * 1024      # <= ~2 MiB padded f32 per input -> 1 block
_VMEM_LIMIT = 40 * 1024 * 1024        # safe on v5e/v6e (128 MiB) and v7x (64 MiB)


# ----------------------------------------------------------------------------
# Trace-time helpers (all Python ints / bools)
# ----------------------------------------------------------------------------
def _tensorcores_per_device() -> int:
    """Best-effort TensorCore count per Pallas-visible device (trace time)."""
    try:
        kind = jax.devices()[0].device_kind.lower()
    except Exception:
        return 1
    one_tc = ("v2", "v3", "v5e", "v5 lite", "v5lite", "v6e", "v6 lite", "v6lite")
    if any(tag in kind for tag in one_tc):
        return 1
    # v4 / v5p megacore and v7x expose 2 TensorCores per device; default to 2 so
    # v7x never loses the split.  A mistaken 2 on a 1-TC part only costs a tiny
    # extra zero-init + (8,width) reduce epilogue.
    return 2


def _vmem_footprint_elems(shape) -> int:
    """Padded-(8,128)-tile element footprint of one full-array VMEM block."""
    if len(shape) == 0:
        return 1024
    last = -(-int(shape[-1]) // _LANE) * _LANE
    if len(shape) == 1:
        return max(8 * last, 1024)                 # conservative 1-D estimate
    second = -(-int(shape[-2]) // 8) * 8
    lead = 1
    for d in shape[:-2]:
        lead *= int(d)
    return lead * second * last


def _plan_tiled(n: int):
    """Lane-dense (rows, width) layout + tile rows for the large, aligned path."""
    width = _LANE
    for w in _WIDTH_CANDIDATES:
        if n % w == 0:
            width = w
            break
    rows = n // width                               # exact: width divides n
    tile_rows = max(8, min(_TARGET_BLOCK_ELEMS // width, (rows // 8) * 8))
    n_tiles = -(-rows // tile_rows)                 # cdiv; last tile may be partial
    return width, rows, tile_rows, n_tiles


# ----------------------------------------------------------------------------
# Pallas kernels
# ----------------------------------------------------------------------------
def _sq_err_sum_small_kernel(x_ref, t_ref, out_ref):
    """Single-block sum((x-t)^2) over the full (original-shape) arrays."""
    d = x_ref[...].astype(jnp.float32) - t_ref[...].astype(jnp.float32)
    out_ref[...] = jnp.full((1, 1), jnp.sum(d * d), jnp.float32)


def _sq_err_none_small_kernel(x_ref, t_ref, out_ref):
    """Single-block elementwise (x-t)^2 in the original shape."""
    d = x_ref[...].astype(jnp.float32) - t_ref[...].astype(jnp.float32)
    out_ref[...] = (d * d).astype(out_ref.dtype)


def _sq_err_sum_tiled_kernel(x_ref, t_ref, out_ref, acc_ref, *,
                             valid_rows, mask_rows):
    """Tiled sum: VPU-only accumulation into a small (8, width) accumulator.

    Grid is (split, steps); the step axis is the reduction axis ('arbitrary').
    Each TensorCore (split index) owns its own acc scratch and output block.
    """
    s = pl.program_id(1)

    @pl.when(s == 0)
    def _():
        acc_ref[...] = jnp.zeros_like(acc_ref)

    tr, w = x_ref.shape
    d = x_ref[...].astype(jnp.float32) - t_ref[...].astype(jnp.float32)
    sq = d * d
    if mask_rows:
        # Ragged last tile and/or clamped out-of-range steps: zero the rows that
        # lie beyond the real array (garbage reads never reach the accumulator).
        tile = pl.program_id(0) * pl.num_programs(1) + s
        row = tile * tr + jax.lax.broadcasted_iota(jnp.int32, (tr, w), 0)
        sq = jnp.where(row < valid_rows, sq, 0.0)
    # Layout-preserving fold of the (tile_rows, width) tile into (8, width):
    # keeps per-step acc load/store traffic tiny (review item #5).
    acc_ref[...] += jnp.sum(sq.reshape(tr // 8, 8, w), axis=0)

    @pl.when(s == pl.num_programs(1) - 1)
    def _():
        out_ref[...] = jnp.full(out_ref.shape, jnp.sum(acc_ref[...]),
                                out_ref.dtype)


def _sq_err_none_tiled_kernel(x_ref, t_ref, out_ref):
    """Tiled elementwise (x-t)^2 with lane-dense output blocks."""
    d = x_ref[...].astype(jnp.float32) - t_ref[...].astype(jnp.float32)
    out_ref[...] = (d * d).astype(out_ref.dtype)


# ----------------------------------------------------------------------------
# pallas_call wrappers
# ----------------------------------------------------------------------------
def _sum_small(x, t):
    out = pl.pallas_call(
        _sq_err_sum_small_kernel,
        out_shape=jax.ShapeDtypeStruct((1, 1), jnp.float32),
    )(x, t)
    return out[0, 0]


def _sum_tiled(x, t):
    n = int(x.size)
    width, rows, tile_rows, n_tiles = _plan_tiled(n)
    xm = x.reshape(rows, width)          # exact -> free bitcast, never a pad
    tm = t.reshape(rows, width)

    split = 2 if (_tensorcores_per_device() >= 2 and n_tiles >= 2) else 1
    steps = -(-n_tiles // split)
    need_clamp = split * steps != n_tiles            # odd tile count w/ split=2
    need_mask = need_clamp or (rows % tile_rows != 0)

    def in_map(c, s):
        idx = c * steps + s
        if need_clamp:
            idx = jnp.minimum(idx, n_tiles - 1)       # keep the DMA in bounds
        return (idx, 0)

    kernel = functools.partial(_sq_err_sum_tiled_kernel,
                               valid_rows=rows, mask_rows=need_mask)
    out = pl.pallas_call(
        kernel,
        out_shape=jax.ShapeDtypeStruct((split, 8, _LANE), jnp.float32),
        grid_spec=pltpu.PrefetchScalarGridSpec(
            num_scalar_prefetch=0,
            grid=(split, steps),
            in_specs=[pl.BlockSpec((tile_rows, width), in_map),
                      pl.BlockSpec((tile_rows, width), in_map)],
            out_specs=pl.BlockSpec((1, 8, _LANE), lambda c, s: (c, 0, 0)),
            scratch_shapes=[pltpu.VMEM((8, width), jnp.float32)],
        ),
        compiler_params=pltpu.CompilerParams(
            dimension_semantics=("parallel", "arbitrary"),
            vmem_limit_bytes=_VMEM_LIMIT,
        ),
    )(xm, tm)
    return jnp.sum(out[:, 0, 0])          # <= 2 partials; single tiny follow-up


def _none_small(x, t, out_dtype):
    return pl.pallas_call(
        _sq_err_none_small_kernel,
        out_shape=jax.ShapeDtypeStruct(x.shape, out_dtype),
    )(x, t)


def _none_tiled(x, t, out_dtype):
    n = int(x.size)
    width, rows, tile_rows, n_tiles = _plan_tiled(n)
    xm = x.reshape(rows, width)
    tm = t.reshape(rows, width)
    out = pl.pallas_call(
        _sq_err_none_tiled_kernel,
        out_shape=jax.ShapeDtypeStruct((rows, width), out_dtype),
        grid_spec=pltpu.PrefetchScalarGridSpec(
            num_scalar_prefetch=0,
            grid=(n_tiles,),
            in_specs=[pl.BlockSpec((tile_rows, width), lambda i: (i, 0)),
                      pl.BlockSpec((tile_rows, width), lambda i: (i, 0))],
            out_specs=pl.BlockSpec((tile_rows, width), lambda i: (i, 0)),
        ),
        compiler_params=pltpu.CompilerParams(
            dimension_semantics=("parallel",),
            vmem_limit_bytes=_VMEM_LIMIT,
        ),
    )(xm, tm)
    return out.reshape(x.shape)           # rows*width == n -> free bitcast


def pallas_sq_err_sum(x, t):
    """sum((x - t)^2) over all elements, accumulated in f32, on TPU."""
    n = int(x.size)
    if n == 0:
        return jnp.float32(0.0)
    if x.ndim == 0:
        d = x.astype(jnp.float32) - t.astype(jnp.float32)
        return d * d
    if _vmem_footprint_elems(x.shape) <= _SINGLE_BLOCK_ELEMS:
        return _sum_small(x, t)
    if n % _LANE == 0:
        return _sum_tiled(x, t)
    # TODO(synk): large tensors whose total size is not a multiple of 128 would
    # need a padding copy (an extra full HBM read+write per input) before a 2-D
    # Pallas layout; a single fused XLA pass is strictly cheaper, so use it.
    d = x.astype(jnp.float32) - t.astype(jnp.float32)
    return jnp.sum(d * d)


def pallas_sq_err_none(x, t):
    """Elementwise (x - t)^2 with the original shape, on TPU."""
    # NOTE: result_type(x, t) keeps integer inputs integer and upcasts mixed
    # bf16/f32 (mirrors the elementwise torch behaviour); floats are the
    # intended use of this criterion.
    out_dtype = jnp.result_type(x.dtype, t.dtype)
    n = int(x.size)
    if n == 0 or x.ndim == 0:
        d = x.astype(jnp.float32) - t.astype(jnp.float32)
        return (d * d).astype(out_dtype)
    if _vmem_footprint_elems(x.shape) <= _SINGLE_BLOCK_ELEMS:
        return _none_small(x, t, out_dtype)
    if n % _LANE == 0:
        return _none_tiled(x, t, out_dtype)
    # TODO(synk): large + lane-misaligned total size: padding / un-padding would
    # add two extra full HBM passes, so fall back to XLA's single fused pass.
    d = x.astype(jnp.float32) - t.astype(jnp.float32)
    return (d * d).astype(out_dtype)


# ----------------------------------------------------------------------------
# Criterion module (JAX mirror of zenkai.lm._assess.Criterion)
# ----------------------------------------------------------------------------
class Criterion:
    """Base class for evaluating functions (Pallas-backed)."""

    def __init__(self, base=None, reduction: str = "mean", maximize: bool = False):
        self.reduction = reduction
        self._maximize = maximize
        self._base = base

    @property
    def maximize(self) -> bool:
        return self._maximize

    def reduce(self, value, reduction_override: str = None):
        reduction = (
            self.reduction
            if self.reduction == "none" or reduction_override is None
            else reduction_override
        )
        if reduction == "none":
            return value
        if reduction == "sum":
            return jnp.sum(value)
        if reduction == "mean":
            return jnp.mean(value)
        raise ValueError(f"Unknown reduction: {reduction}")

    def assess(self, x, t, reduction_override: str = None):
        return self.forward(x, t, reduction_override)

    def forward(self, x, t, reduction_override: str = None):
        if self._base is not None:
            return self._base(x, t, reduction_override)
        raise RuntimeError("The criterion evaluation has not been defined")

    def __call__(self, x, t, reduction_override: str = None):
        return self.forward(x, t, reduction_override)


class _MSEBase:
    """Squared-error base criterion whose hot path runs in Pallas kernels."""

    # TODO(synk): arbitrary user-supplied nn.Module bases have no generic
    # Pallas equivalent; only the squared-error base is implemented here.

    def __init__(self, reduction: str = "mean"):
        self.reduction = reduction

    def __call__(self, x, t, reduction_override: str = None):
        reduction = (
            self.reduction
            if self.reduction == "none" or reduction_override is None
            else reduction_override
        )
        if reduction == "none":
            return pallas_sq_err_none(x, t)
        total = pallas_sq_err_sum(x, t)
        if reduction == "sum":
            return total
        if reduction == "mean":
            # single fused scalar op; the heavy reduction already ran in-kernel
            return total / jnp.float32(x.size)
        raise ValueError(f"Unknown reduction: {reduction}")


# ----------------------------------------------------------------------------
if __name__ == "__main__":
    key = jax.random.PRNGKey(0)
    kx, kt = jax.random.split(key)

    crit = Criterion(base=_MSEBase(reduction="mean"), reduction="mean",
                     maximize=False)

    # 1) small NCHW input -> single-block (full-array) kernels, no padding copy
    x = jax.random.normal(kx, (2, 4, 16, 16), dtype=jnp.float32)
    t = jax.random.normal(kt, (2, 4, 16, 16), dtype=jnp.float32)
    loss_mean = jax.block_until_ready(crit(x, t))
    loss_sum = jax.block_until_ready(crit(x, t, reduction_override="sum"))
    loss_none = jax.block_until_ready(crit(x, t, reduction_override="none"))
    ref = (x - t) ** 2
    assert jnp.allclose(loss_mean, jnp.mean(ref), rtol=1e-5, atol=1e-5)
    assert jnp.allclose(loss_sum, jnp.sum(ref), rtol=1e-5, atol=1e-4)
    assert jnp.allclose(loss_none, ref, rtol=1e-5, atol=1e-5)
    assert loss_none.shape == x.shape and loss_none.dtype == x.dtype

    # 2) lane-misaligned small shape -> still a single Pallas block, no pad
    x2 = jax.random.normal(kx, (3, 5, 7, 11), dtype=jnp.float32)
    t2 = jax.random.normal(kt, (3, 5, 7, 11), dtype=jnp.float32)
    s2 = jax.block_until_ready(crit(x2, t2, reduction_override="sum"))
    n2 = jax.block_until_ready(crit(x2, t2, reduction_override="none"))
    ref2 = (x2 - t2) ** 2
    assert jnp.allclose(s2, jnp.sum(ref2), rtol=1e-5, atol=1e-4)
    assert jnp.allclose(n2, ref2, rtol=1e-5, atol=1e-5)
    assert n2.shape == x2.shape

    # 3) larger lane-aligned input -> tiled lane-dense kernels (2 tiles, the
    #    second one partial, exercising the masked-tail path)
    x3 = jax.random.normal(kx, (2, 600, 1024), dtype=jnp.float32)
    t3 = jax.random.normal(kt, (2, 600, 1024), dtype=jnp.float32)
    m3 = jax.block_until_ready(crit(x3, t3))
    s3 = jax.block_until_ready(crit(x3, t3, reduction_override="sum"))
    n3 = jax.block_until_ready(crit(x3, t3, reduction_override="none"))
    ref3 = (x3 - t3) ** 2
    assert jnp.allclose(m3, jnp.mean(ref3), rtol=2e-4, atol=1e-5)
    assert jnp.allclose(s3, jnp.sum(ref3), rtol=2e-4, atol=0.0)
    assert jnp.allclose(n3, ref3, rtol=1e-5, atol=1e-5)
    assert n3.shape == x3.shape

    print("KERNEL_OK")
</pallas_src>

<mosaic_0001>
module attributes {stable_mosaic.version = 11 : i64} {
  func.func @_sq_err_sum_small_kernel(%arg0: memref<2x4x16x16xf32, #tpu.memory_space<vmem>>, %arg1: memref<2x4x16x16xf32, #tpu.memory_space<vmem>>, %arg2: memref<1x1xf32, #tpu.memory_space<vmem>>) attributes {dimension_semantics = [], scalar_prefetch = 0 : i64, scratch_operands = 0 : i64, tpu.core_type = #tpu.core_type<tc>} {
    %c0 = arith.constant 0 : index
    %c0_0 = arith.constant 0 : index
    %c0_1 = arith.constant 0 : index
    %c0_2 = arith.constant 0 : index
    %0 = vector.load %arg0[%c0, %c0_0, %c0_1, %c0_2] : memref<2x4x16x16xf32, #tpu.memory_space<vmem>>, vector<2x4x16x16xf32>
    %c0_3 = arith.constant 0 : index
    %c0_4 = arith.constant 0 : index
    %c0_5 = arith.constant 0 : index
    %c0_6 = arith.constant 0 : index
    %1 = vector.load %arg1[%c0_3, %c0_4, %c0_5, %c0_6] : memref<2x4x16x16xf32, #tpu.memory_space<vmem>>, vector<2x4x16x16xf32>
    %2 = arith.subf %0, %1 : vector<2x4x16x16xf32>
    %3 = arith.mulf %2, %2 : vector<2x4x16x16xf32>
    %4 = vector.shape_cast %3 : vector<2x4x16x16xf32> to vector<1x2x4x16x16xf32>
    %cst = arith.constant dense<0.000000e+00> : vector<1xf32>
    %5 = vector.multi_reduction <add>, %4, %cst [1, 2, 3, 4] : vector<1x2x4x16x16xf32> to vector<1xf32>
    %6 = vector.shape_cast %5 : vector<1xf32> to vector<1x1x1x1x1xf32>
    %7 = vector.extract %6[0, 0, 0, 0, 0] : f32 from vector<1x1x1x1x1xf32>
    %8 = vector.broadcast %7 : f32 to vector<1x1xf32>
    %c0_7 = arith.constant 0 : index
    %c0_8 = arith.constant 0 : index
    %9 = vector.load %arg2[%c0_7, %c0_8] : memref<1x1xf32, #tpu.memory_space<vmem>>, vector<1x1xf32>
    tpu.vector_store %arg2[%c0_7, %c0_8], %8 {strides = array<i32>} : memref<1x1xf32, #tpu.memory_space<vmem>>, vector<1x1xf32>,
    return
  }
}

</mosaic_0001>

<bundles_post_ra>
// kernel: tpu_custom_call.1
= control target key start
LH: loop header
LB: loop body
LE: loop exit
PB: predicated region body
PF: predicated region fallthrough
CT: control target
= control target key end

     0   :  { %7 = vsyncpa [#allocation3], 0  ;;  %s282_s0 = inlined_call_operand.hbm [shape: f32[2,4,16,16], index: 0, kind: input, shape index: {}]   ;;  %s283_s1 = inlined_call_operand.hbm [shape: f32[2,4,16,16], index: 1, kind: input, shape index: {}]   ;;  %s284_s2 = inlined_call_operand.hbm [shape: f32[1,1], index: 2, kind: output, shape index: {}]  }
   0x1   :  { %8 = vsyncpa [#allocation6], 0 }
   0x2   :  { %9 = vsyncpa [#allocation4], 0  ;;  %s237_s9 = smov [#allocation2]  }
   0x3   :  { %s15_s10 = sshll.u32 %s237_s9, 4  ;;  %s16_s10 = int_to_ptr.vmem [resolvable:$true] %s15_s10 }
   0x4   :  { %s179_s11 = scalar_lea.vmem %s16_s10, 2048  ;;  %p184_p1 = scmp.lt.s32.totalorder %s16_s10, %s16_s10 }
   0x5   :  { %p180_p0 = scmp.ne.s32.totalorder %s16_s10, %s179_s11  ;;  %p185_p2 = scmp.lt.s32.totalorder %s179_s11, %s179_s11 }
   0x7   :  { %p186_p3 = por %p185_p2, %p184_p1 }
   0x9   :  { %p187_p4 = pnand %p186_p3, %p180_p0 }
   0xb   :  { %190 = shalt.err (!%p187_p4)
}
   0xc   :  { %s238_s12 = smov 128   ;;  %s239_s13 = smov 8  }
   0xd   :  { %21 = dma.hbm_to_vmem [thread:$0]  %s282_s0, 2048, %s16_s10, [#allocation3], %s238_s12, %s238_s12, %s239_s13  }
   0xe   :  { %s240_s16 = smov [#allocation5]  }
   0xf   :  { %s27_s17 = sshll.u32 %s240_s16, 4  ;;  %s28_s17 = int_to_ptr.vmem [resolvable:$true] %s27_s17 }
  0x10   :  { %s199_s18 = scalar_lea.vmem %s28_s17, 2048  ;;  %p204_p6 = scmp.lt.s32.totalorder %s28_s17, %s28_s17 }
  0x11   :  { %p200_p5 = scmp.ne.s32.totalorder %s28_s17, %s199_s18  ;;  %p205_p7 = scmp.lt.s32.totalorder %s199_s18, %s199_s18 }
  0x13   :  { %p206_p8 = por %p205_p7, %p204_p6 }
  0x15   :  { %p207_p9 = pnand %p206_p8, %p200_p5 }
  0x17   :  { %210 = shalt.err (!%p207_p9)
}
  0x18   :  { %33 = dma.hbm_to_vmem [thread:$0]  %s283_s1, 2048, %s28_s17, [#allocation6], %s238_s12, %s238_s12, %s239_s13  }
  0x19   :  { %231 = dma.done.wait [#allocation3], 2048  }
  0x1a   :  { %232 = vsyncadd [#allocation3], 4294965248 }
  0x1b   :  { %233 = dma.done.wait [#allocation6], 2048  }
  0x1c   :  { %234 = vsyncadd [#allocation6], 4294965248  ;;  %v40_v0 = vld [vmem:[#allocation2] sm:$0xff]  ;;  %v41_v1 = vld [vmem:[#allocation2 + $0x8] sm:$0xff]  ;;  %vm104_vm0 = vcmask 130048   ;;  %s241_s0 = smov [#allocation7]  }
  0x1d   :  { %v42_v2 = vld [vmem:[#allocation2 + $0x10] sm:$0xff]  ;;  %v56_v3 = vld [vmem:[#allocation5] sm:$0xff]  ;;  %v57_v4 = vld [vmem:[#allocation5 + $0x8] sm:$0xff]  ;;  %s154_s1 = sshll.u32 %s241_s0, 4  ;;  %vm146_vm1 = vcmask 0   ;;  %s155_s1 = int_to_ptr.vmem [resolvable:$true] %s154_s1 }
  0x1e   :  { %v43_v5 = vld [vmem:[#allocation2 + $0x18] sm:$0xff]  ;;  %v58_v6 = vld [vmem:[#allocation5 + $0x10] sm:$0xff]  ;;  %v72_v8 = vsub.f32 %v40_v0, %v56_v3  ;;  %v73_v9 = vsub.f32 %v41_v1, %v57_v4  ;;  %v44_v11 = vld [vmem:[#allocation2 + $0x20] sm:$0xff]  ;;  %s211_s22 = scalar_lea.vmem %s155_s1, 16  ;;  %s215_s23 = scalar_lea.vmem %s155_s1, 32 }
  0x1f   :  { %v59_v7 = vld [vmem:[#allocation5 + $0x18] sm:$0xff]  ;;  %v74_v10 = vsub.f32 %v42_v2, %v58_v6  ;;  %v60_v12 = vld [vmem:[#allocation5 + $0x20] sm:$0xff]  ;;  %v45_v14 = vld [vmem:[#allocation2 + $0x28] sm:$0xff]  ;;  %p212_p10 = scmp.ne.s32.totalorder %s155_s1, %s211_s22  ;;  %p216_p11 = scmp.lt.s32.totalorder %s155_s1, %s155_s1 }
  0x20   :  { %v75_v13 = vsub.f32 %v43_v5, %v59_v7  ;;  %v61_v15 = vld [vmem:[#allocation5 + $0x28] sm:$0xff]  ;;  %v88_v16 = vmul.f32 %v72_v8, %v72_v8  ;;  %v76_v17 = vsub.f32 %v44_v11, %v60_v12  ;;  %v89_v18 = vmul.f32 %v73_v9, %v73_v9  ;;  %v46_v20 = vld [vmem:[#allocation2 + $0x30] sm:$0xff]  ;;  %v47_v24 = vld [vmem:[#allocation2 + $0x38] sm:$0xff]  ;;  %p217_p12 = scmp.lt.s32.totalorder %s215_s23, %s211_s22 }
  0x21   :  { %v90_v19 = vmul.f32 %v74_v10, %v74_v10  ;;  %v62_v21 = vld [vmem:[#allocation5 + $0x30] sm:$0xff]  ;;  %v77_v22 = vsub.f32 %v45_v14, %v61_v15  ;;  %v63_v25 = vld [vmem:[#allocation5 + $0x38] sm:$0xff]  ;;  %v48_v31 = vld [vmem:[#allocation2 + $0x40] sm:$0xff] }
  0x22   :  { %v91_v23 = vmul.f32 %v75_v13, %v75_v13  ;;  %v105_v26 = vsel %vm104_vm0, %v88_v16, 0.0  ;;  %v78_v27 = vsub.f32 %v46_v20, %v62_v21  ;;  %v92_v28 = vmul.f32 %v76_v17, %v76_v17  ;;  %v64_v32 = vld [vmem:[#allocation5 + $0x40] sm:$0xff]  ;;  %v49_v37 = vld [vmem:[#allocation2 + $0x48] sm:$0xff]  ;;  %v50_v43 = vld [vmem:[#allocation2 + $0x50] sm:$0xff]  ;;  %p218_p13 = por %p217_p12, %p216_p11 }
  0x23   :  { %v106_v29 = vsel %vm104_vm0, %v89_v18, 0.0  ;;  %v108_v30 = vsel %vm104_vm0, %v90_v19, 0.0  ;;  %v79_v34 = vsub.f32 %v47_v24, %v63_v25  ;;  %v93_v35 = vmul.f32 %v77_v22, %v77_v22  ;;  %v65_v38 = vld [vmem:[#allocation5 + $0x48] sm:$0xff]  ;;  %v66_v44 = vld [vmem:[#allocation5 + $0x50] sm:$0xff]  ;;  %v51_v49 = vld [vmem:[#allocation2 + $0x58] sm:$0xff] }
  0x24   :  { %v107_v33 = vadd.f32 %v106_v29, %v105_v26  ;;  %v110_v36 = vsel %vm104_vm0, %v91_v23, 0.0  ;;  %v80_v40 = vsub.f32 %v48_v31, %v64_v32  ;;  %v94_v41 = vmul.f32 %v78_v27, %v78_v27  ;;  %v67_v50 = vld [vmem:[#allocation5 + $0x58] sm:$0xff]  ;;  %v52_v55 = vld [vmem:[#allocation2 + $0x60] sm:$0xff]  ;;  %v53_v61 = vld [vmem:[#allocation2 + $0x68] sm:$0xff]  ;;  %p219_p0 = pnand %p218_p13, %p212_p10 }
  0x25   :  { %v112_v42 = vsel %vm104_vm0, %v92_v28, 0.0  ;;  %v81_v46 = vsub.f32 %v49_v37, %v65_v38  ;;  %v95_v47 = vmul.f32 %v79_v34, %v79_v34  ;;  %v114_v48 = vsel %vm104_vm0, %v93_v35, 0.0  ;;  %v68_v56 = vld [vmem:[#allocation5 + $0x60] sm:$0xff]  ;;  %v69_v62 = vld [vmem:[#allocation5 + $0x68] sm:$0xff]  ;;  %v54_v3 = vld [vmem:[#allocation2 + $0x70] sm:$0xff] }
  0x26   :  { %v109_v39 = vadd.f32 %v108_v30, %v107_v33  ;;  %v82_v52 = vsub.f32 %v50_v43, %v66_v44  ;;  %v96_v53 = vmul.f32 %v80_v40, %v80_v40  ;;  %v116_v54 = vsel %vm104_vm0, %v94_v41, 0.0  ;;  %v70_v4 = vld [vmem:[#allocation5 + $0x70] sm:$0xff]  ;;  %v55_v9 = vld [vmem:[#allocation2 + $0x78] sm:$0xff] }
  0x27   :  { %v83_v58 = vsub.f32 %v51_v49, %v67_v50  ;;  %v97_v59 = vmul.f32 %v81_v46, %v81_v46  ;;  %v118_v60 = vsel %vm104_vm0, %v95_v47, 0.0  ;;  %v84_v0 = vsub.f32 %v52_v55, %v68_v56  ;;  %v71_v10 = vld [vmem:[#allocation5 + $0x78] sm:$0xff] }
  0x28   :  { %v111_v45 = vadd.f32 %v110_v36, %v109_v39  ;;  %v98_v1 = vmul.f32 %v82_v52, %v82_v52  ;;  %v120_v2 = vsel %vm104_vm0, %v96_v53, 0.0  ;;  %v85_v6 = vsub.f32 %v53_v61, %v69_v62 }
  0x29   :  { %v99_v7 = vmul.f32 %v83_v58, %v83_v58  ;;  %v122_v8 = vsel %vm104_vm0, %v97_v59, 0.0  ;;  %v86_v12 = vsub.f32 %v54_v3, %v70_v4  ;;  %v100_v13 = vmul.f32 %v84_v0, %v84_v0 }
  0x2a   :  { %v113_v51 = vadd.f32 %v112_v42, %v111_v45  ;;  %v124_v14 = vsel %vm104_vm0, %v98_v1, 0.0  ;;  %v87_v16 = vsub.f32 %v55_v9, %v71_v10  ;;  %v101_v17 = vmul.f32 %v85_v6, %v85_v6 }
  0x2b   :  { %v126_v18 = vsel %vm104_vm0, %v99_v7, 0.0  ;;  %v102_v20 = vmul.f32 %v86_v12, %v86_v12  ;;  %v128_v21 = vsel %vm104_vm0, %v100_v13, 0.0 }
  0x2c   :  { %v115_v57 = vadd.f32 %v114_v48, %v113_v51  ;;  %v103_v23 = vmul.f32 %v87_v16, %v87_v16  ;;  %v130_v24 = vsel %vm104_vm0, %v101_v17, 0.0 }
  0x2d   :  { %v132_v26 = vsel %vm104_vm0, %v102_v20, 0.0 }
  0x2e   :  { %v117_v63 = vadd.f32 %v116_v54, %v115_v57  ;;  %v134_v28 = vsel %vm104_vm0, %v103_v23, 0.0 }
  0x30   :  { %v119_v5 = vadd.f32 %v118_v60, %v117_v63 }
  0x32   :  { %v121_v11 = vadd.f32 %v120_v2, %v119_v5 }
  0x34   :  { %v123_v15 = vadd.f32 %v122_v8, %v121_v11 }
  0x36   :  { %v125_v19 = vadd.f32 %v124_v14, %v123_v15 }
  0x38   :  { %v127_v22 = vadd.f32 %v126_v18, %v125_v19 }
  0x3a   :  { %v129_v25 = vadd.f32 %v128_v21, %v127_v22 }
  0x3c   :  { %v131_v27 = vadd.f32 %v130_v24, %v129_v25 }
  0x3e   :  { %v133_v29 = vadd.f32 %v132_v26, %v131_v27 }
  0x40   :  { %v135_v30 = vadd.f32 %v134_v28, %v133_v29 }
  0x42   :  { %136 = vadd.xlane.f32.xlu0 %v135_v30 }
  0xcb   :  { %v137_v31 = vpop.xlane.xlu0 %136 }
  0xcc   :  { %v138_v32 = vrot.slane %v137_v31, 4 }
  0xce   :  { %v139_v33 = vadd.f32 %v138_v32, %v137_v31 }
  0xd0   :  { %v140_v34 = vrot.slane %v139_v33, 2 }
  0xd2   :  { %v141_v35 = vadd.f32 %v140_v34, %v139_v33 }
  0xd4   :  { %v142_v36 = vrot.slane %v141_v35, 1 }
  0xd6   :  { %v143_v37 = vadd.f32 %v142_v36, %v141_v35 }
  0xd8   :  { %164 = vpush %v143_v37 }
 0x109   :  { %s165_s21 = spop %164 }
 0x10a   :  { %v145_v38 = vstv %s165_s21 }
 0x10b   :  { %147 = vst.msk [vmem:[#allocation7] sm:$0x1] %vm146_vm1, %v145_v38 }
 0x10c   :  { %222 = shalt.err (!%p219_p0)
}
 0x10d   :  { %157 = dma.vmem_to_hbm [thread:$0]  %s155_s1, 16, %s284_s2, [#allocation4]  }
 0x10e   :  { %235 = dma.done.wait [#allocation4], 16  }
 0x10f   :  { %236 = vsyncadd [#allocation4], 4294967280 }
 0x110   :  { %161 = vsyncpa [#allocation3], 1 }
 0x111   :  { %162 = vsyncpa [#allocation6], 1 }
 0x112   :  { %163 = vsyncpa [#allocation4], 1 }

</bundles_post_ra>
